<compile_context>
chip_gen: v5e
topology: v5e:2x2
jax: 0.10.0
libtpu: 0.0.40
codegen_flags: <defaults>
</compile_context>

<pallas_src>
import jax
import jax.numpy as jnp
from jax.experimental import pallas as pl
from jax.experimental.pallas import tpu as pltpu

_LANES = 128
_LANES_LOG2 = 7
_SUBLANES = 8


def _pick_bt(B, max_bt=8):
    """Largest divisor of B that is <= max_bt while keeping >= 2 grid steps when B >= 2."""
    limit = min(max_bt, B // 2) if B >= 2 else 1
    limit = max(limit, 1)
    for bt in range(limit, 0, -1):
        if B % bt == 0:
            return bt
    return 1


def _reg_weighted_l1_kernel(feat_ref, ind_ref, mask_ref, target_ref, out_ref):
    # feat_ref:   [Bt, C, nb, 128]  native dtype (f32 / bf16), HW = nb*128 lane-dense
    # ind_ref:    [Bt, K, 1]        i32   (flat spatial indices)
    # mask_ref:   [Bt, K, C]        f32
    # target_ref: [Bt, K, C]        f32
    # out_ref:    [1, 8, 128]       f32   (row 0: lane 0 = masked-L1 partial, lane 1 = mask sum)
    Bt = feat_ref.shape[0]
    C = feat_ref.shape[1]
    nb = feat_ref.shape[2]
    K = ind_ref.shape[1]
    fdtype = feat_ref.dtype

    q_ids = jax.lax.broadcasted_iota(jnp.int32, (K, nb), 1)
    r_ids = jax.lax.broadcasted_iota(jnp.int32, (K, _LANES), 1)

    # Single lane-dense accumulator across the whole Bt x C loop; one reduce at the end.
    acc = jnp.zeros((K, _LANES), dtype=jnp.float32)

    for bi in range(Bt):                                   # Bt is small & static
        ind = ind_ref[bi]                                  # [K, 1] i32
        # Decompose flat spatial index into (128-lane block, lane within block).
        q = jnp.right_shift(ind, _LANES_LOG2)              # ind // 128
        r = jnp.bitwise_and(ind, _LANES - 1)               # ind %  128
        oh_q = (q == q_ids).astype(fdtype)                 # [K, nb]  one-hot, feat dtype (exact)
        oh_r = (r == r_ids).astype(jnp.float32)            # [K, 128] one-hot, f32 for VPU epilogue

        maskv = mask_ref[bi]                               # [K, C] f32
        targ = target_ref[bi]                              # [K, C] f32

        for c in range(C):                                 # C is small & static
            # Stage 1 (MXU): pick the 128-lane block per k:  [K, nb] @ [nb, 128] -> [K, 128] f32
            g = jnp.dot(oh_q, feat_ref[bi, c], preferred_element_type=jnp.float32)
            m_c = maskv[:, c:c + 1]                        # [K, 1]
            t_c = targ[:, c:c + 1]                         # [K, 1]
            # Stage 2 fused epilogue (VPU only, full [K,128] vregs): the selected lane
            # contributes |(pred - target) * mask|, all other lanes are zeroed by oh_r.
            acc = acc + jnp.abs((g - t_c) * m_c) * oh_r

    num = jnp.sum(acc)
    den = jnp.sum(mask_ref[...])

    # Full (8, 128) output tile per step: row 0 lane 0 = num, row 0 lane 1 = den, rest zero.
    row = jax.lax.broadcasted_iota(jnp.int32, (1, _SUBLANES, _LANES), 1)
    lane = jax.lax.broadcasted_iota(jnp.int32, (1, _SUBLANES, _LANES), 2)
    out_ref[...] = jnp.where(
        (row == 0) & (lane == 0), num,
        jnp.where((row == 0) & (lane == 1), den, jnp.float32(0.0)))


def reg_weighted_l1_loss(output, mask, ind, target):
    """output: [B, C, H, W]; mask: [B, K, C]; ind: [B, K] int; target: [B, K, C]."""
    B, C, H, W = output.shape
    K = ind.shape[1]
    HW = H * W

    # Keep feat in its native dtype; reshapes below are free (contiguous NCHW).
    if HW % _LANES == 0:
        feat = output.reshape(B, C, HW)
    else:
        # TODO(synk): tail-lane masking inside the kernel would avoid this HBM copy;
        # standard CenterNet feature maps have H*W % 128 == 0 so this path is rare.
        HW_pad = pl.cdiv(HW, _LANES) * _LANES
        feat = jnp.pad(output.reshape(B, C, HW), ((0, 0), (0, 0), (0, HW_pad - HW)))
        HW = HW_pad
    nb = HW // _LANES
    feat = feat.reshape(B, C, nb, _LANES)

    ind3 = ind.astype(jnp.int32).reshape(B, K, 1)
    mask_f = mask.astype(jnp.float32)
    target_f = target.astype(jnp.float32)

    Bt = _pick_bt(B)
    steps = B // Bt

    partial = pl.pallas_call(
        _reg_weighted_l1_kernel,
        out_shape=jax.ShapeDtypeStruct((steps, _SUBLANES, _LANES), jnp.float32),
        grid=(steps,),
        in_specs=[
            pl.BlockSpec((Bt, C, nb, _LANES), lambda b: (b, 0, 0, 0)),
            pl.BlockSpec((Bt, K, 1), lambda b: (b, 0, 0)),
            pl.BlockSpec((Bt, K, C), lambda b: (b, 0, 0)),
            pl.BlockSpec((Bt, K, C), lambda b: (b, 0, 0)),
        ],
        out_specs=pl.BlockSpec((1, _SUBLANES, _LANES), lambda b: (b, 0, 0)),
        compiler_params=pltpu.CompilerParams(
            dimension_semantics=("parallel",)),
    )(feat, ind3, mask_f, target_f)

    num_total = jnp.sum(partial[:, 0, 0])
    den_total = jnp.sum(partial[:, 0, 1])
    return num_total / (den_total + jnp.float32(0.0001))


def _reference_loss(output, mask, ind, target):
    B, C, H, W = output.shape
    K = ind.shape[1]
    feat = jnp.transpose(output, (0, 2, 3, 1)).reshape(B, H * W, C).astype(jnp.float32)
    idx = jnp.broadcast_to(ind[..., None].astype(jnp.int32), (B, K, C))
    pred = jnp.take_along_axis(feat, idx, axis=1)
    mask = mask.astype(jnp.float32)
    target = target.astype(jnp.float32)
    num = jnp.sum(jnp.abs(pred * mask - target * mask))
    return num / (jnp.sum(mask) + 0.0001)


if __name__ == "__main__":
    # small shapes consistent with the module: output [B,C,H,W], ind [B,K], mask/target [B,K,C]
    B, C, H, W, K = 2, 4, 16, 16, 8
    key = jax.random.PRNGKey(0)
    k1, k2, k3, k4 = jax.random.split(key, 4)

    output = jax.random.normal(k1, (B, C, H, W), dtype=jnp.float32)
    target = jax.random.normal(k2, (B, K, C), dtype=jnp.float32)
    ind = jax.random.randint(k3, (B, K), 0, H * W, dtype=jnp.int32)
    mask = (jax.random.uniform(k4, (B, K, C)) > 0.3).astype(jnp.float32)

    loss = reg_weighted_l1_loss(output, mask, ind, target)
    loss = jax.block_until_ready(loss)

    ref = _reference_loss(output, mask, ind, target)
    assert jnp.allclose(loss, ref, rtol=1e-5, atol=1e-5), (loss, ref)

    print("KERNEL_OK")
</pallas_src>

<mosaic_0001>
module attributes {stable_mosaic.version = 11 : i64} {
  func.func @_reg_weighted_l1_kernel(%arg0: i32, %arg1: memref<1x4x2x128xf32, #tpu.memory_space<vmem>>, %arg2: memref<1x8x1xi32, #tpu.memory_space<vmem>>, %arg3: memref<1x8x4xf32, #tpu.memory_space<vmem>>, %arg4: memref<1x8x4xf32, #tpu.memory_space<vmem>>, %arg5: memref<1x8x128xf32, #tpu.memory_space<vmem>>) attributes {dimension_semantics = [#tpu.dimension_semantics<parallel>], iteration_bounds = array<i64: 2>, scalar_prefetch = 0 : i64, scratch_operands = 0 : i64, tpu.core_type = #tpu.core_type<tc>, window_params = [{transform_indices = @transform_0, window_bounds = array<i64: 1, 4, 2, 128>}, {transform_indices = @transform_1, window_bounds = array<i64: 1, 8, 1>}, {transform_indices = @transform_2, window_bounds = array<i64: 1, 8, 4>}, {transform_indices = @transform_3, window_bounds = array<i64: 1, 8, 4>}, {transform_indices = @transform_4, window_bounds = array<i64: 1, 8, 128>}]} {
    %0 = tpu.iota {dimensions = array<i32: 1>} : vector<8x2xi32>
    %1 = tpu.iota {dimensions = array<i32: 1>} : vector<8x128xi32>
    %cst = arith.constant 0.000000e+00 : f32
    %2 = vector.broadcast %cst : f32 to vector<8x128xf32>
    %c0 = arith.constant 0 : index
    %c0_0 = arith.constant 0 : index
    %c0_1 = arith.constant 0 : index
    %3 = vector.load %arg2[%c0, %c0_0, %c0_1] : memref<1x8x1xi32, #tpu.memory_space<vmem>>, vector<1x8x1xi32>
    %4 = vector.shape_cast %3 : vector<1x8x1xi32> to vector<8x1xi32>
    %c7_i32 = arith.constant 7 : i32
    %5 = vector.broadcast %c7_i32 : i32 to vector<8x1xi32>
    %6 = arith.shrsi %4, %5 : vector<8x1xi32>
    %c127_i32 = arith.constant 127 : i32
    %7 = vector.broadcast %c127_i32 : i32 to vector<8x1xi32>
    %8 = arith.andi %4, %7 : vector<8x1xi32>
    %9 = vector.broadcast %6 : vector<8x1xi32> to vector<8x2xi32>
    %10 = arith.cmpi eq, %9, %0 : vector<8x2xi32>
    %11 = arith.extui %10 : vector<8x2xi1> to vector<8x2xi32>
    %12 = arith.sitofp %11 : vector<8x2xi32> to vector<8x2xf32>
    %13 = vector.broadcast %8 : vector<8x1xi32> to vector<8x128xi32>
    %14 = arith.cmpi eq, %13, %1 : vector<8x128xi32>
    %15 = arith.extui %14 : vector<8x128xi1> to vector<8x128xi32>
    %16 = arith.sitofp %15 : vector<8x128xi32> to vector<8x128xf32>
    %c0_2 = arith.constant 0 : index
    %c0_3 = arith.constant 0 : index
    %c0_4 = arith.constant 0 : index
    %17 = vector.load %arg3[%c0_2, %c0_3, %c0_4] : memref<1x8x4xf32, #tpu.memory_space<vmem>>, vector<1x8x4xf32>
    %18 = vector.shape_cast %17 : vector<1x8x4xf32> to vector<8x4xf32>
    %c0_5 = arith.constant 0 : index
    %c0_6 = arith.constant 0 : index
    %c0_7 = arith.constant 0 : index
    %19 = vector.load %arg4[%c0_5, %c0_6, %c0_7] : memref<1x8x4xf32, #tpu.memory_space<vmem>>, vector<1x8x4xf32>
    %20 = vector.shape_cast %19 : vector<1x8x4xf32> to vector<8x4xf32>
    %c0_8 = arith.constant 0 : index
    %c0_9 = arith.constant 0 : index
    %c0_10 = arith.constant 0 : index
    %c0_11 = arith.constant 0 : index
    %21 = vector.load %arg1[%c0_8, %c0_9, %c0_10, %c0_11] : memref<1x4x2x128xf32, #tpu.memory_space<vmem>>, vector<1x1x2x128xf32>
    %22 = vector.shape_cast %21 : vector<1x1x2x128xf32> to vector<2x128xf32>
    %cst_12 = arith.constant dense<0.000000e+00> : vector<8x128xf32>
    %23 = tpu.matmul %12, %22, %cst_12 {dimension_numbers = #tpu.dot_dimension_numbers<[1], [0], [0], [1], [0, 0, 1, 1], [], []>} : vector<8x2xf32>, vector<2x128xf32>, vector<8x128xf32> -> vector<8x128xf32>
    %24 = vector.extract_strided_slice %18 {offsets = [0, 0], sizes = [8, 1], strides = [1, 1]} : vector<8x4xf32> to vector<8x1xf32>
    %25 = vector.extract_strided_slice %20 {offsets = [0, 0], sizes = [8, 1], strides = [1, 1]} : vector<8x4xf32> to vector<8x1xf32>
    %26 = vector.broadcast %25 : vector<8x1xf32> to vector<8x128xf32>
    %27 = arith.subf %23, %26 : vector<8x128xf32>
    %28 = vector.broadcast %24 : vector<8x1xf32> to vector<8x128xf32>
    %29 = arith.mulf %27, %28 : vector<8x128xf32>
    %30 = math.absf %29 : vector<8x128xf32>
    %31 = arith.mulf %30, %16 : vector<8x128xf32>
    %32 = arith.addf %2, %31 : vector<8x128xf32>
    %c0_13 = arith.constant 0 : index
    %c1 = arith.constant 1 : index
    %c0_14 = arith.constant 0 : index
    %c0_15 = arith.constant 0 : index
    %33 = vector.load %arg1[%c0_13, %c1, %c0_14, %c0_15] : memref<1x4x2x128xf32, #tpu.memory_space<vmem>>, vector<1x1x2x128xf32>
    %34 = vector.shape_cast %33 : vector<1x1x2x128xf32> to vector<2x128xf32>
    %cst_16 = arith.constant dense<0.000000e+00> : vector<8x128xf32>
    %35 = tpu.matmul %12, %34, %cst_16 {dimension_numbers = #tpu.dot_dimension_numbers<[1], [0], [0], [1], [0, 0, 1, 1], [], []>} : vector<8x2xf32>, vector<2x128xf32>, vector<8x128xf32> -> vector<8x128xf32>
    %36 = vector.extract_strided_slice %18 {offsets = [0, 1], sizes = [8, 1], strides = [1, 1]} : vector<8x4xf32> to vector<8x1xf32>
    %37 = vector.extract_strided_slice %20 {offsets = [0, 1], sizes = [8, 1], strides = [1, 1]} : vector<8x4xf32> to vector<8x1xf32>
    %38 = vector.broadcast %37 : vector<8x1xf32> to vector<8x128xf32>
    %39 = arith.subf %35, %38 : vector<8x128xf32>
    %40 = vector.broadcast %36 : vector<8x1xf32> to vector<8x128xf32>
    %41 = arith.mulf %39, %40 : vector<8x128xf32>
    %42 = math.absf %41 : vector<8x128xf32>
    %43 = arith.mulf %42, %16 : vector<8x128xf32>
    %44 = arith.addf %32, %43 : vector<8x128xf32>
    %c0_17 = arith.constant 0 : index
    %c2 = arith.constant 2 : index
    %c0_18 = arith.constant 0 : index
    %c0_19 = arith.constant 0 : index
    %45 = vector.load %arg1[%c0_17, %c2, %c0_18, %c0_19] : memref<1x4x2x128xf32, #tpu.memory_space<vmem>>, vector<1x1x2x128xf32>
    %46 = vector.shape_cast %45 : vector<1x1x2x128xf32> to vector<2x128xf32>
    %cst_20 = arith.constant dense<0.000000e+00> : vector<8x128xf32>
    %47 = tpu.matmul %12, %46, %cst_20 {dimension_numbers = #tpu.dot_dimension_numbers<[1], [0], [0], [1], [0, 0, 1, 1], [], []>} : vector<8x2xf32>, vector<2x128xf32>, vector<8x128xf32> -> vector<8x128xf32>
    %48 = vector.extract_strided_slice %18 {offsets = [0, 2], sizes = [8, 1], strides = [1, 1]} : vector<8x4xf32> to vector<8x1xf32>
    %49 = vector.extract_strided_slice %20 {offsets = [0, 2], sizes = [8, 1], strides = [1, 1]} : vector<8x4xf32> to vector<8x1xf32>
    %50 = vector.broadcast %49 : vector<8x1xf32> to vector<8x128xf32>
    %51 = arith.subf %47, %50 : vector<8x128xf32>
    %52 = vector.broadcast %48 : vector<8x1xf32> to vector<8x128xf32>
    %53 = arith.mulf %51, %52 : vector<8x128xf32>
    %54 = math.absf %53 : vector<8x128xf32>
    %55 = arith.mulf %54, %16 : vector<8x128xf32>
    %56 = arith.addf %44, %55 : vector<8x128xf32>
    %c0_21 = arith.constant 0 : index
    %c3 = arith.constant 3 : index
    %c0_22 = arith.constant 0 : index
    %c0_23 = arith.constant 0 : index
    %57 = vector.load %arg1[%c0_21, %c3, %c0_22, %c0_23] : memref<1x4x2x128xf32, #tpu.memory_space<vmem>>, vector<1x1x2x128xf32>
    %58 = vector.shape_cast %57 : vector<1x1x2x128xf32> to vector<2x128xf32>
    %cst_24 = arith.constant dense<0.000000e+00> : vector<8x128xf32>
    %59 = tpu.matmul %12, %58, %cst_24 {dimension_numbers = #tpu.dot_dimension_numbers<[1], [0], [0], [1], [0, 0, 1, 1], [], []>} : vector<8x2xf32>, vector<2x128xf32>, vector<8x128xf32> -> vector<8x128xf32>
    %60 = vector.extract_strided_slice %18 {offsets = [0, 3], sizes = [8, 1], strides = [1, 1]} : vector<8x4xf32> to vector<8x1xf32>
    %61 = vector.extract_strided_slice %20 {offsets = [0, 3], sizes = [8, 1], strides = [1, 1]} : vector<8x4xf32> to vector<8x1xf32>
    %62 = vector.broadcast %61 : vector<8x1xf32> to vector<8x128xf32>
    %63 = arith.subf %59, %62 : vector<8x128xf32>
    %64 = vector.broadcast %60 : vector<8x1xf32> to vector<8x128xf32>
    %65 = arith.mulf %63, %64 : vector<8x128xf32>
    %66 = math.absf %65 : vector<8x128xf32>
    %67 = arith.mulf %66, %16 : vector<8x128xf32>
    %68 = arith.addf %56, %67 : vector<8x128xf32>
    %69 = vector.shape_cast %68 : vector<8x128xf32> to vector<1x8x128xf32>
    %cst_25 = arith.constant dense<0.000000e+00> : vector<1xf32>
    %70 = vector.multi_reduction <add>, %69, %cst_25 [1, 2] : vector<1x8x128xf32> to vector<1xf32>
    %71 = vector.shape_cast %70 : vector<1xf32> to vector<1x1x1xf32>
    %72 = vector.extract %71[0, 0, 0] : f32 from vector<1x1x1xf32>
    %c0_26 = arith.constant 0 : index
    %c0_27 = arith.constant 0 : index
    %c0_28 = arith.constant 0 : index
    %73 = vector.load %arg3[%c0_26, %c0_27, %c0_28] : memref<1x8x4xf32, #tpu.memory_space<vmem>>, vector<1x8x4xf32>
    %74 = vector.shape_cast %73 : vector<1x8x4xf32> to vector<1x1x8x4xf32>
    %cst_29 = arith.constant dense<0.000000e+00> : vector<1xf32>
    %75 = vector.multi_reduction <add>, %74, %cst_29 [1, 2, 3] : vector<1x1x8x4xf32> to vector<1xf32>
    %76 = vector.shape_cast %75 : vector<1xf32> to vector<1x1x1x1xf32>
    %77 = vector.extract %76[0, 0, 0, 0] : f32 from vector<1x1x1x1xf32>
    %78 = tpu.iota {dimensions = array<i32: 1>} : vector<1x8x128xi32>
    %79 = tpu.iota {dimensions = array<i32: 2>} : vector<1x8x128xi32>
    %c0_i32 = arith.constant 0 : i32
    %80 = vector.broadcast %c0_i32 : i32 to vector<1x8x128xi32>
    %81 = arith.cmpi eq, %78, %80 : vector<1x8x128xi32>
    %c0_i32_30 = arith.constant 0 : i32
    %82 = vector.broadcast %c0_i32_30 : i32 to vector<1x8x128xi32>
    %83 = arith.cmpi eq, %79, %82 : vector<1x8x128xi32>
    %84 = arith.andi %81, %83 : vector<1x8x128xi1>
    %c0_i32_31 = arith.constant 0 : i32
    %85 = vector.broadcast %c0_i32_31 : i32 to vector<1x8x128xi32>
    %86 = arith.cmpi eq, %78, %85 : vector<1x8x128xi32>
    %c1_i32 = arith.constant 1 : i32
    %87 = vector.broadcast %c1_i32 : i32 to vector<1x8x128xi32>
    %88 = arith.cmpi eq, %79, %87 : vector<1x8x128xi32>
    %89 = arith.andi %86, %88 : vector<1x8x128xi1>
    %cst_32 = arith.constant 0.000000e+00 : f32
    %90 = vector.broadcast %77 : f32 to vector<1x8x128xf32>
    %91 = vector.broadcast %cst_32 : f32 to vector<1x8x128xf32>
    %92 = arith.select %89, %90, %91 : vector<1x8x128xi1>, vector<1x8x128xf32>
    %93 = vector.broadcast %72 : f32 to vector<1x8x128xf32>
    %94 = arith.select %84, %93, %92 : vector<1x8x128xi1>, vector<1x8x128xf32>
    %c0_33 = arith.constant 0 : index
    %c0_34 = arith.constant 0 : index
    %c0_35 = arith.constant 0 : index
    %95 = vector.load %arg5[%c0_33, %c0_34, %c0_35] : memref<1x8x128xf32, #tpu.memory_space<vmem>>, vector<1x8x128xf32>
    tpu.vector_store %arg5[%c0_33, %c0_34, %c0_35], %94 {strides = array<i32>} : memref<1x8x128xf32, #tpu.memory_space<vmem>>, vector<1x8x128xf32>,
    return
  }
  func.func @transform_0(%arg0: i32) -> (i32, i32, i32, i32) {
    %c0_i32 = arith.constant 0 : i32
    %c0_i32_0 = arith.constant 0 : i32
    %c0_i32_1 = arith.constant 0 : i32
    %c0_i32_2 = arith.constant 0 : i32
    return %arg0, %c0_i32, %c0_i32_0, %c0_i32_1 : i32, i32, i32, i32
  }
  func.func @transform_1(%arg0: i32) -> (i32, i32, i32) {
    %c0_i32 = arith.constant 0 : i32
    %c0_i32_0 = arith.constant 0 : i32
    %c0_i32_1 = arith.constant 0 : i32
    return %arg0, %c0_i32, %c0_i32_0 : i32, i32, i32
  }
  func.func @transform_2(%arg0: i32) -> (i32, i32, i32) {
    %c0_i32 = arith.constant 0 : i32
    %c0_i32_0 = arith.constant 0 : i32
    %c0_i32_1 = arith.constant 0 : i32
    return %arg0, %c0_i32, %c0_i32_0 : i32, i32, i32
  }
  func.func @transform_3(%arg0: i32) -> (i32, i32, i32) {
    %c0_i32 = arith.constant 0 : i32
    %c0_i32_0 = arith.constant 0 : i32
    %c0_i32_1 = arith.constant 0 : i32
    return %arg0, %c0_i32, %c0_i32_0 : i32, i32, i32
  }
  func.func @transform_4(%arg0: i32) -> (i32, i32, i32) {
    %c0_i32 = arith.constant 0 : i32
    %c0_i32_0 = arith.constant 0 : i32
    %c0_i32_1 = arith.constant 0 : i32
    return %arg0, %c0_i32, %c0_i32_0 : i32, i32, i32
  }
}

</mosaic_0001>

<bundles_post_ra>
// kernel: tpu_custom_call.1
= control target key start
LH: loop header
LB: loop body
LE: loop exit
PB: predicated region body
PF: predicated region fallthrough
CT: control target
= control target key end

     0   :  { %9 = vsyncpa [#allocation3], 0  ;;  %s847_s0 = inlined_call_operand.vmem [shape: f32[2,4,2,128], index: 0, kind: input, shape index: {}]   ;;  %s848_s1 = inlined_call_operand.vmem [shape: s32[2,8,1], index: 1, kind: input, shape index: {}]   ;;  %s849_s2 = inlined_call_operand.vmem [shape: f32[2,8,4], index: 2, kind: input, shape index: {}]   ;;  %s850_s3 = inlined_call_operand.vmem [shape: f32[2,8,4], index: 3, kind: input, shape index: {}]   ;;  %s851_s4 = inlined_call_operand.hbm [shape: f32[2,8,128], index: 4, kind: output, shape index: {}]  }
   0x1   :  { %11 = vsyncpa [#allocation3 + $0x1], 0  ;;  %s745_s15 = smov 0   ;;  %s747_s16 = smov 0  }
   0x2   :  { %s749_s17 = smov 0   ;;  %s751_s18 = smov 0  }
   0x3 LB: > { %s766_s19 = sadd.s32 4294967295, %s713_s18   ;;  %s567_s20 = sadd.s32 4294967294, %s713_s18   ;;  %s713_s18 = sphi %s751_s18, %s857_s18   ;;  %s709_s17 = sphi %s749_s17, %s856_s17   ;;  %s705_s16 = sphi %s747_s16, %s855_s16   ;;  %s701_s15 = sphi %s745_s15, %s854_s15  }
   0x4   : > { %s770_s21 = sadd.s32 1, %s713_s18   ;;  %s128_s22 = sadd.s32 1, %s709_s17 }
   0x5   : > { %s125_s23 = ssub.s32 %s713_s18, %s770_s21  ;;  %p138_p0 = scmp.ne.s32.totalorder %s709_s17, %s705_s16 }
   0x6   : > { %p126_p1 = scmp.eq.s32.totalorder %s125_s23, 0  ;;  %p139_p2 = scmp.eq.s32.totalorder %s766_s19, 1 }
   0x7   : > { %p144_p3 = scmp.ne.s32.totalorder %s705_s16, %s701_s15  ;;  %p145_p4 = scmp.eq.s32.totalorder %s567_s20, 1 }
   0x8   : > { %s781_s24 = scalar_select %p126_p1, %s709_s17, %s128_s22  }
   0x9   : > { %p783_p5 = por %p139_p2, %p138_p0  ;;  %p787_p6 = por %p145_p4, %p144_p3 }
   0xa   : > { %p570_p7 = scmp.ge.s32.totalorder %s713_s18, 1  ;;  %p192_p8 = scmp.lt.s32.totalorder %s713_s18, 3 }
   0xc   : > { %p193_p9 = pnand %p570_p7, %p192_p8 }
   0xd   : > { %p230_p10 = scmp.lt.s32.totalorder (!%p193_p9), %s766_s19, 1  ;;  %s227_s20 = sand.u32 (!%p193_p9), 1, %s705_s16  }
   0xe   : > { %196 = sbr.rel (%p193_p9) target bundleno = 473 (0x1d9), region = 36  ;;  %s571_s22 = sshll.u32 (!%p193_p9), %s227_s20, 3 }
   0xf   : > { %s591_s23 = sshll.u32 (!%p193_p9), %s766_s19, 3  ;;  %s229_s30 = scalar_lea.vmem (!%p193_p9), [#allocation2], %s571_s22 }
  0x10   : > { %s467_s29 = scalar_lea.hbm (!%p193_p9), %s851_s4, %s591_s23  ;;  %s671_s13 = scalar_lea.hbm (!%p193_p9), %s851_s4, 16 }
  0x11   : > { %s471_s7 = sshll.u32 (!%p193_p9), %s467_s29, 4  ;;  %s472_s7 = int_to_ptr.hbm [resolvable:$true] %s471_s7 }
  0x12   : > { %s665_s9 = sshra.s32 (!%p193_p9), %s472_s7, 4  ;;  %s666_s9 = int_to_ptr.hbm [resolvable:$true] %s665_s9 }
  0x13   : > { %v715_v0 = vmov 0   ;;  %s231_s27 = scalar_select %p230_p10, %s766_s19, 1  ;;  %vm271_vm0 = vcmask 1041408   ;;  %v716_v9 = vmov 1   ;;  %v717_v11 = vmov 3  }
  0x14   : > { %643 = vset.pattern.permute.xlu0 %v715_v0  ;;  %644 = vset.pattern.permute.xlu1 %v716_v9  ;;  %v718_v12 = vmov 2   ;;  %v247_v13 = vlaneseq  ;;  %vm267_vm1 = vcmask 15360   ;;  %v719_v16 = vmov 0.0   ;;  %s457_s19 = scalar_lea.sflag [#allocation3], %s227_s20  ;;  %s667_s10 = scalar_lea.hbm %s666_s9, 8 }
  0x15   : > { %s594_s28 = sshll.u32 %s231_s27, 3  ;;  %646 = vset.pattern.permute.xlu2 %v716_v9  ;;  %vm433_vm3 = vcmask 31744   ;;  %p668_p11 = scmp.ne.s32.totalorder %s666_s9, %s667_s10 }
  0x16   : > { %s238_s5 = scalar_lea.vmem %s848_s1, %s594_s28  ;;  %s246_s8 = scalar_lea.vmem %s850_s3, %s594_s28  ;;  %v808_v14 = vand.u32 127, %v247_v13 }
  0x17   : > { %v249_v1 = vld [vmem:[%s238_s5] sm:$0xff]  ;;  %s234_s11 = scalar_lea.vmem %s847_s0, %s594_s28  ;;  %s242_s14 = scalar_lea.vmem %s849_s2, %s594_s28 }
  0x18   : > { %v250_v2 = vshra.s32 %v249_v1, 7  ;;  %v265_v3 = vld [vmem:[%s246_s8] sm:$0xff]  ;;  %v251_v4 = vand.u32 127, %v249_v1  ;;  %vm449_vm6 = vcmp.eq.s32.totalorder %v808_v14, 1  ;;  %vm447_vm7 = vcmp.eq.s32.totalorder %v808_v14, 0  ;;  %s469_s5 = sshll.u32 %s229_s30, 4  ;;  %p669_p12 = pnand %p668_p11, %p783_p5  ;;  %s470_s5 = int_to_ptr.vmem [resolvable:$true] %s469_s5 }
  0x19   : > { %v266_v5 = vld [vmem:[%s234_s11] sm:$0x3]  ;;  %v581_v6 = vld [vmem:[%s234_s11 + $0x2] sm:$0x3]  ;;  %v584_v7 = vld [vmem:[%s234_s11 + $0x4] sm:$0x3]  ;;  %336 = vperm.xlu1 %644, %v265_v3   ;;  %p672_p0 = scmp.lt.s32.totalorder %s666_s9, %s851_s4  ;;  %p673_p1 = scmp.lt.s32.totalorder %s671_s13, %s667_s10 }
  0x1a   : > { %253 = vperm.xlu0 %643, %v250_v2   ;;  %579 = vmatpush.msk.msra.mxu0 %vm271_vm0, %v266_v5  ;;  %v587_v8 = vld [vmem:[%s234_s11 + $0x6] sm:$0x3]  ;;  %v445_v2 = vshrl.u32 %v247_v13, 7  ;;  %p670_p13 = pneg %p669_p12 }
  0x1b   : > { %582 = vmatpush.msk.msra.mxu1 %vm271_vm0, %v581_v6  ;;  %585 = vmatpush.msk.msra.mxu2 %vm271_vm0, %v584_v7  ;;  %v264_v10 = vld [vmem:[%s242_s14] sm:$0xff]  ;;  %p674_p2 = por %p673_p1, %p672_p0 }
  0x1c   : > { %588 = vmatpush.msk.msra.mxu3 %vm271_vm0, %v587_v8  ;;  %341 = vperm.xlu2 %646, %v264_v10   ;;  %v434_v18 = vsel %vm433_vm3, %v264_v10, 0.0  ;;  %vm446_vm5 = vcmp.eq.s32.totalorder %v445_v2, 0 }
  0x1d   : > { %vm450_vm8 = vmand %vm446_vm5, %vm449_vm6  ;;  %p675_p3 = pnand %p674_p2, %p670_p13 }
  0x1e   : > { %vm448_vm9 = vmand %vm446_vm5, %vm447_vm7 }
  0x21   : > { %645 = vset.pattern.permute.xlu1 %v715_v0 }
  0x22   : > { %297 = vperm.xlu0 %643, %v265_v3   ;;  %303 = vperm.xlu1 %645, %v264_v10  }
  0x24   : > { %647 = vset.pattern.permute.xlu2 %v718_v12 }
  0x25   : > { %374 = vperm.xlu2 %647, %v265_v3  }
  0x2a   : > { %259 = vperm.xlu0 %643, %v251_v4   ;;  %648 = vset.pattern.permute.xlu1 %v718_v12 }
  0x2b   : > { %379 = vperm.xlu1 %648, %v264_v10  }
  0x2d   : > { %649 = vset.pattern.permute.xlu2 %v717_v11 }
  0x2e   : > { %412 = vperm.xlu2 %649, %v265_v3  }
  0x32   : > { %650 = vset.pattern.permute.xlu0 %v717_v11 }
  0x33   : > { %417 = vperm.xlu0 %650, %v264_v10  }
  0x57   : > { %435 = vadd.xlane.f32.xlu2 %v434_v18 }
  0x76   : > { %v342_v19 = vpop.permute.xlu2 %341 }
  0x7f   : > { %v375_v22 = vpop.permute.xlu2 %374 }
  0x88   : > { %v413_v31 = vpop.permute.xlu2 %412 }
  0x8b   : > { %v337_v20 = vpop.permute.xlu1 %336 }
  0x8c   : > { %v254_v15 = vpop.permute.xlu0 %253 }
  0x8d   : > { %vm255_vm2 = vcmp.eq.s32.totalorder %v254_v15, %v808_v14 }
  0x8e   : > { %v577_v17 = vsel %vm255_vm2, 1.0, %v719_v16 }
  0x8f   : > { %580 = vmatmul.msk.f32.vlgmr.msra.gmra.mxu0 %vm267_vm1, %v577_v17  ;;  %583 = vmatmul.msk.f32.vlgmr.msra.gmra.mxu1 %vm267_vm1, %v577_v17 }
  0x90   : > { %586 = vmatmul.msk.f32.vlgmr.msra.gmra.mxu2 %vm267_vm1, %v577_v17  ;;  %589 = vmatmul.msk.f32.vlgmr.msra.gmra.mxu3 %vm267_vm1, %v577_v17 }
  0x94   : > { %v298_v21 = vpop.permute.xlu0 %297  ;;  %v304_v23 = vpop.permute.xlu1 %303 }
  0x9c   : > { %v260_v24 = vpop.permute.xlu0 %259 }
  0x9d   : > { %vm261_vm4 = vcmp.eq.s32.totalorder %v260_v24, %v808_v14  ;;  %v380_v34 = vpop.permute.xlu1 %379 }
  0x9e   : > { %v578_v40 = vsel %vm261_vm4, 1.0, %v719_v16 }
  0xa5   : > { %v418_v35 = vpop.permute.xlu0 %417 }
  0xca   : > { %v436_v52 = vpop.xlane.xlu2 %435 }
  0xcb   : > { %v437_v53 = vrot.slane %v436_v52, 4 }
  0xcd   : > { %v438_v54 = vadd.f32 %v437_v53, %v436_v52 }
  0xcf   : > { %v439_v55 = vrot.slane %v438_v54, 2 }
  0xd1   : > { %v440_v59 = vadd.f32 %v439_v55, %v438_v54 }
  0xd3   : > { %v441_v62 = vrot.slane %v440_v59, 1 }
  0xd5   : > { %v442_v1 = vadd.f32 %v441_v62, %v440_v59 }
 0x10c   : > { %v292_v25 = vpop.f32.mrf.mxu0  ;;  %v332_v26 = vpop.f32.mrf.mxu1 }
 0x10d   : > { %v300_v27 = vsub.f32 %v292_v25, %v298_v21  ;;  %v339_v28 = vsub.f32 %v332_v26, %v337_v20 }
 0x10f   : > { %v306_v29 = vmul.f32 %v304_v23, %v300_v27  ;;  %v344_v30 = vmul.f32 %v342_v19, %v339_v28 }
 0x111   : > { %v307_v32 = vand.u32 2147483647, %v306_v29  ;;  %v345_v33 = vand.u32 2147483647, %v344_v30 }
 0x113   : > { %v370_v36 = vpop.f32.mrf.mxu2  ;;  %v408_v37 = vpop.f32.mrf.mxu3  ;;  %v308_v41 = vmul.f32 %v578_v40, %v307_v32  ;;  %v346_v42 = vmul.f32 %v578_v40, %v345_v33 }
 0x114   : > { %v377_v38 = vsub.f32 %v370_v36, %v375_v22  ;;  %v415_v39 = vsub.f32 %v408_v37, %v413_v31 }
 0x115   : > { %v347_v48 = vadd.f32 %v346_v42, %v308_v41 }
 0x116   : > { %v382_v43 = vmul.f32 %v380_v34, %v377_v38  ;;  %v420_v44 = vmul.f32 %v418_v35, %v415_v39 }
 0x118   : > { %v383_v45 = vand.u32 2147483647, %v382_v43  ;;  %v421_v46 = vand.u32 2147483647, %v420_v44 }
 0x11a   : > { %v384_v47 = vmul.f32 %v578_v40, %v383_v45  ;;  %v422_v49 = vmul.f32 %v578_v40, %v421_v46 }
 0x11c   : > { %v385_v50 = vadd.f32 %v384_v47, %v347_v48 }
 0x11e   : > { %v423_v51 = vadd.f32 %v422_v49, %v385_v50 }
 0x120   : > { %424 = vadd.xlane.f32.xlu1 %v423_v51 }
 0x193   : > { %v425_v56 = vpop.xlane.xlu1 %424 }
 0x194   : > { %v426_v57 = vrot.slane %v425_v56, 4 }
 0x196   : > { %v427_v58 = vadd.f32 %v426_v57, %v425_v56 }
 0x198   : > { %v428_v60 = vrot.slane %v427_v58, 2 }
 0x19a   : > { %v429_v61 = vadd.f32 %v428_v60, %v427_v58 }
 0x19c   : > { %v430_v63 = vrot.slane %v429_v61, 1 }
 0x19e   : > { %v431_v0 = vadd.f32 %v430_v63, %v429_v61 }
 0x1a0   : > { %595 = vpush %v431_v0 }
 0x1a1   : > { %597 = vpush %v442_v1 }
 0x1d1   : > { %s596_s6 = spop %595 }
 0x1d2   : > { %v453_v3 = vstv %s596_s6  ;;  %s598_s8 = spop %597 }
 0x1d3   : > { %v451_v4 = vstv %s598_s8 }
 0x1d4   : > { %v452_v5 = vsel %vm450_vm8, %v451_v4, 0.0 }
 0x1d5   : > { %v454_v6 = vsel %vm448_vm9, %v453_v3, %v452_v5 }
 0x1d6   : > { %455 = vst [vmem:[%s229_s30] sm:$0xff] %v454_v6 }
 0x1d7   : > { %678 = shalt.err (!%p675_p3)
}
 0x1d8   : > { %599 = dma.vmem_to_hbm [thread:$0]  (%p783_p5), %s470_s5, 128, %s472_s7, %s457_s19  }
 0x1d9 PF: > { %p605_p4 = scmp.ge.s32.totalorder %s713_s18, 2  ;;  %s483_s20 = sand.u32 1, %s701_s15  }
 0x1da   : > { %s484_s23 = scalar_lea.sflag [#allocation3], %s483_s20 }
 0x1db   : > { %p602_p7 = pnand %p605_p4, %p787_p6 }
 0x1dd   : > { %p603_p8 = pneg %p602_p7 }
 0x1df   : > { %696 = dma.done.wait (%p603_p8), %s484_s23, 128  }
 0x1e0   : > { %698 = vsyncadd (%p603_p8), %s484_s23, 4294967168  ;;  %p14_p9 = scmp.ge.s32.totalorder %s770_s21, 4   ;;  %s854_s15 = smov %s705_s16 }
 0x1e1   : > { %s855_s16 = smov %s709_s17  ;;  %s856_s17 = smov %s781_s24 }
 0x1e2   : > { %s857_s18 = smov %s770_s21  ;;  %16 = sbr.rel (!%p14_p9) target bundleno = 3 (0x3), region = 83 }
 0x1e7   :  { %490 = vsyncpa [#allocation3], 1 }
 0x1e8   :  { %492 = vsyncpa [#allocation3 + $0x1], 1 }

</bundles_post_ra>
